<compile_context>
chip_gen: v5e
topology: v5e:2x2
jax: 0.10.0
libtpu: 0.0.40
codegen_flags: <defaults>
</compile_context>

<pallas_src>
import jax
import jax.numpy as jnp
from jax import lax
from jax.experimental import pallas as pl
from jax.experimental.pallas import tpu as pltpu


def _wrapped_model_kernel(p_ref, wflat_ref, cb_ref, fwp_ref, fbp_ref, out_ref):
    # p_ref    : (K_pad, HW)    im2col patches for this batch element
    # wflat_ref: (Cout, K_pad)  flattened conv weight, K order = (ky, kx, cin)
    # cb_ref   : (Cout, 1)      conv bias
    # fwp_ref  : (Cout, Npad)   fc weight^T, pre-scaled by 1/(H*W), zero-padded in N
    # fbp_ref  : (1, Npad)      fc bias, zero-padded in N
    # out_ref  : (8, Npad)      padded logits block (row 0 is the real result)

    # Conv as a single MXU matmul: (Cout, K) @ (K, HW) -> (Cout, HW).
    acc = jnp.dot(wflat_ref[...], p_ref[...],
                  preferred_element_type=jnp.float32)          # (Cout, HW)

    # Bias + ReLU on the lane-dense (Cout, HW) layout (pure VPU work).
    acc = jnp.maximum(acc + cb_ref[...], 0.0)

    # Global average pool: single lane-axis reduction (scale folded into fwp).
    pooled = jnp.sum(acc, axis=1, keepdims=True)               # (Cout, 1)

    # Tiny fc as VPU broadcast-multiply + sublane reduce (no MXU fill/drain).
    logits = jnp.sum(pooled * fwp_ref[...], axis=0, keepdims=True) + fbp_ref[...]  # (1, Npad)

    # Lane- and sublane-dense store: one full (8, 128) vreg, unmasked vst.
    out_ref[...] = jnp.broadcast_to(logits, out_ref.shape).astype(out_ref.dtype)


def _forward_impl(x_nchw, conv_w, conv_b, fc_w, fc_b):
    """x_nchw: (B, Cin, H, W) f32; torch-layout weights. Returns (B, num_classes)."""
    B, Cin, H, W = x_nchw.shape
    Cout = conv_w.shape[0]
    num_classes = fc_w.shape[0]
    HW = H * W
    K = 9 * Cin
    K_PAD = ((K + 7) // 8) * 8                      # pad contraction dim to sublane multiple
    NPAD = ((num_classes + 127) // 128) * 128       # lane-dense padded logits width

    # ---- layout plumbing (fused by XLA inside this jit) ----
    xp = jnp.pad(x_nchw, ((0, 0), (0, 0), (1, 1), (1, 1)))      # spatial pad=1
    wins = [lax.slice(xp, (0, 0, ky, kx), (B, Cin, ky + H, kx + W))
            for ky in range(3) for kx in range(3)]              # 9 x (B, Cin, H, W)
    patches = jnp.stack(wins, axis=1).reshape(B, K, HW)         # (B, 9*Cin, H*W)
    patches = jnp.pad(patches, ((0, 0), (0, K_PAD - K), (0, 0))).astype(jnp.float32)

    # Conv weight (Cout, Cin, 3, 3) -> (Cout, (ky,kx,cin)) to match patch order.
    wflat = jnp.transpose(conv_w, (0, 2, 3, 1)).reshape(Cout, K)
    wflat = jnp.pad(wflat, ((0, 0), (0, K_PAD - K))).astype(jnp.float32)
    cb = conv_b.reshape(Cout, 1).astype(jnp.float32)

    # fc weight^T with the 1/(H*W) pooling scale folded in, zero-padded to Npad.
    fwp = jnp.zeros((Cout, NPAD), jnp.float32).at[:, :num_classes].set(fc_w.T / float(HW))
    fbp = jnp.zeros((1, NPAD), jnp.float32).at[:, :num_classes].set(fc_b)

    out_pad = pl.pallas_call(
        _wrapped_model_kernel,
        out_shape=jax.ShapeDtypeStruct((B, 8, NPAD), jnp.float32),
        grid=(B,),
        in_specs=[
            pl.BlockSpec((None, K_PAD, HW), lambda b: (b, 0, 0)),   # per-batch patches
            pl.BlockSpec((Cout, K_PAD), lambda b: (0, 0)),          # conv weight (constant block)
            pl.BlockSpec((Cout, 1), lambda b: (0, 0)),              # conv bias
            pl.BlockSpec((Cout, NPAD), lambda b: (0, 0)),           # fc weight (scaled, padded)
            pl.BlockSpec((1, NPAD), lambda b: (0, 0)),              # fc bias (padded)
        ],
        out_specs=pl.BlockSpec((None, 8, NPAD), lambda b: (b, 0, 0)),
        compiler_params=pltpu.CompilerParams(
            dimension_semantics=("parallel",)),                     # 2nd TC on v7x
    )(patches, wflat, cb, fwp, fbp)

    return out_pad[:, 0, :num_classes]                              # (B, num_classes)


wrapped_model_forward = jax.jit(_forward_impl)


def _reference_forward(x_nchw, conv_w, conv_b, fc_w, fc_b):
    """Pure-JAX reference mirroring the PyTorch forward."""
    y = lax.conv_general_dilated(
        x_nchw, conv_w, window_strides=(1, 1), padding=((1, 1), (1, 1)),
        dimension_numbers=("NCHW", "OIHW", "NCHW"))
    y = y + conv_b[None, :, None, None]
    y = jnp.maximum(y, 0.0)
    feats = jnp.mean(y, axis=(2, 3))                 # (B, Cout)
    return feats @ fc_w.T + fc_b[None, :]


if __name__ == "__main__":
    key = jax.random.PRNGKey(0)
    k_x, k_cw, k_cb, k_fw, k_fb = jax.random.split(key, 5)

    B, Cin, H, W = 2, 4, 16, 16
    Cout, num_classes = 8, 10

    x = jax.random.normal(k_x, (B, Cin, H, W), jnp.float32)
    conv_w = jax.random.normal(k_cw, (Cout, Cin, 3, 3), jnp.float32) * 0.1
    conv_b = jax.random.normal(k_cb, (Cout,), jnp.float32) * 0.1
    fc_w = jax.random.normal(k_fw, (num_classes, Cout), jnp.float32) * 0.1
    fc_b = jax.random.normal(k_fb, (num_classes,), jnp.float32) * 0.1

    out = wrapped_model_forward(x, conv_w, conv_b, fc_w, fc_b)
    out = jax.block_until_ready(out)

    ref = _reference_forward(x, conv_w, conv_b, fc_w, fc_b)
    assert out.shape == (B, num_classes)
    assert jnp.allclose(out, ref, atol=1e-4, rtol=1e-4), "mismatch vs reference"

    print("KERNEL_OK")
</pallas_src>

<mosaic_0001>
module attributes {stable_mosaic.version = 11 : i64} {
  func.func @_wrapped_model_kernel(%arg0: i32, %arg1: memref<1x40x256xf32, #tpu.memory_space<vmem>>, %arg2: memref<8x40xf32, #tpu.memory_space<vmem>>, %arg3: memref<8x1xf32, #tpu.memory_space<vmem>>, %arg4: memref<8x128xf32, #tpu.memory_space<vmem>>, %arg5: memref<1x128xf32, #tpu.memory_space<vmem>>, %arg6: memref<1x8x128xf32, #tpu.memory_space<vmem>>) attributes {dimension_semantics = [#tpu.dimension_semantics<parallel>], iteration_bounds = array<i64: 2>, scalar_prefetch = 0 : i64, scratch_operands = 0 : i64, tpu.core_type = #tpu.core_type<tc>, window_params = [{transform_indices = @transform_0, window_bounds = array<i64: 1, 40, 256>}, {pipeline_mode = #tpu.pipeline_mode<synchronous>, transform_indices = @transform_1, window_bounds = array<i64: 8, 40>}, {pipeline_mode = #tpu.pipeline_mode<synchronous>, transform_indices = @transform_2, window_bounds = array<i64: 8, 1>}, {pipeline_mode = #tpu.pipeline_mode<synchronous>, transform_indices = @transform_3, window_bounds = array<i64: 8, 128>}, {pipeline_mode = #tpu.pipeline_mode<synchronous>, transform_indices = @transform_4, window_bounds = array<i64: 1, 128>}, {transform_indices = @transform_5, window_bounds = array<i64: 1, 8, 128>}]} {
    %c0 = arith.constant 0 : index
    %c0_0 = arith.constant 0 : index
    %0 = vector.load %arg2[%c0, %c0_0] : memref<8x40xf32, #tpu.memory_space<vmem>>, vector<8x40xf32>
    %c0_1 = arith.constant 0 : index
    %c0_2 = arith.constant 0 : index
    %c0_3 = arith.constant 0 : index
    %1 = vector.load %arg1[%c0_1, %c0_2, %c0_3] : memref<1x40x256xf32, #tpu.memory_space<vmem>>, vector<1x40x256xf32>
    %2 = vector.shape_cast %1 : vector<1x40x256xf32> to vector<40x256xf32>
    %cst = arith.constant dense<0.000000e+00> : vector<8x256xf32>
    %3 = tpu.matmul %0, %2, %cst {dimension_numbers = #tpu.dot_dimension_numbers<[1], [0], [0], [1], [0, 0, 1, 1], [], []>} : vector<8x40xf32>, vector<40x256xf32>, vector<8x256xf32> -> vector<8x256xf32>
    %c0_4 = arith.constant 0 : index
    %c0_5 = arith.constant 0 : index
    %4 = vector.load %arg3[%c0_4, %c0_5] : memref<8x1xf32, #tpu.memory_space<vmem>>, vector<8x1xf32>
    %5 = vector.broadcast %4 : vector<8x1xf32> to vector<8x256xf32>
    %6 = arith.addf %3, %5 : vector<8x256xf32>
    %cst_6 = arith.constant 0.000000e+00 : f32
    %7 = vector.broadcast %cst_6 : f32 to vector<8x256xf32>
    %8 = arith.maximumf %6, %7 : vector<8x256xf32>
    %cst_7 = arith.constant dense<0.000000e+00> : vector<8xf32>
    %9 = vector.multi_reduction <add>, %8, %cst_7 [1] : vector<8x256xf32> to vector<8xf32>
    %10 = vector.shape_cast %9 : vector<8xf32> to vector<8x1xf32>
    %c0_8 = arith.constant 0 : index
    %c0_9 = arith.constant 0 : index
    %11 = vector.load %arg4[%c0_8, %c0_9] : memref<8x128xf32, #tpu.memory_space<vmem>>, vector<8x128xf32>
    %12 = vector.broadcast %10 : vector<8x1xf32> to vector<8x128xf32>
    %13 = arith.mulf %12, %11 : vector<8x128xf32>
    %cst_10 = arith.constant dense<0.000000e+00> : vector<128xf32>
    %14 = vector.multi_reduction <add>, %13, %cst_10 [0] : vector<8x128xf32> to vector<128xf32>
    %15 = vector.shape_cast %14 : vector<128xf32> to vector<1x128xf32>
    %c0_11 = arith.constant 0 : index
    %c0_12 = arith.constant 0 : index
    %16 = vector.load %arg5[%c0_11, %c0_12] : memref<1x128xf32, #tpu.memory_space<vmem>>, vector<1x128xf32>
    %17 = arith.addf %15, %16 : vector<1x128xf32>
    %18 = vector.shape_cast %17 : vector<1x128xf32> to vector<1x128xf32>
    %19 = vector.broadcast %18 : vector<1x128xf32> to vector<8x128xf32>
    %c0_13 = arith.constant 0 : index
    %c0_14 = arith.constant 0 : index
    %c0_15 = arith.constant 0 : index
    %20 = vector.load %arg6[%c0_13, %c0_14, %c0_15] : memref<1x8x128xf32, #tpu.memory_space<vmem>>, vector<1x8x128xf32>
    %21 = vector.shape_cast %20 : vector<1x8x128xf32> to vector<8x128xf32>
    %22 = vector.shape_cast %19 : vector<8x128xf32> to vector<1x8x128xf32>
    tpu.vector_store %arg6[%c0_13, %c0_14, %c0_15], %22 {strides = array<i32>} : memref<1x8x128xf32, #tpu.memory_space<vmem>>, vector<1x8x128xf32>,
    return
  }
  func.func @transform_0(%arg0: i32) -> (i32, i32, i32) {
    %c0_i32 = arith.constant 0 : i32
    %c0_i32_0 = arith.constant 0 : i32
    %c0_i32_1 = arith.constant 0 : i32
    return %arg0, %c0_i32, %c0_i32_0 : i32, i32, i32
  }
  func.func @transform_1(%arg0: i32) -> (i32, i32) {
    %c0_i32 = arith.constant 0 : i32
    %c0_i32_0 = arith.constant 0 : i32
    %c0_i32_1 = arith.constant 0 : i32
    return %c0_i32, %c0_i32_0 : i32, i32
  }
  func.func @transform_2(%arg0: i32) -> (i32, i32) {
    %c0_i32 = arith.constant 0 : i32
    %c0_i32_0 = arith.constant 0 : i32
    %c0_i32_1 = arith.constant 0 : i32
    return %c0_i32, %c0_i32_0 : i32, i32
  }
  func.func @transform_3(%arg0: i32) -> (i32, i32) {
    %c0_i32 = arith.constant 0 : i32
    %c0_i32_0 = arith.constant 0 : i32
    %c0_i32_1 = arith.constant 0 : i32
    return %c0_i32, %c0_i32_0 : i32, i32
  }
  func.func @transform_4(%arg0: i32) -> (i32, i32) {
    %c0_i32 = arith.constant 0 : i32
    %c0_i32_0 = arith.constant 0 : i32
    %c0_i32_1 = arith.constant 0 : i32
    return %c0_i32, %c0_i32_0 : i32, i32
  }
  func.func @transform_5(%arg0: i32) -> (i32, i32, i32) {
    %c0_i32 = arith.constant 0 : i32
    %c0_i32_0 = arith.constant 0 : i32
    %c0_i32_1 = arith.constant 0 : i32
    return %arg0, %c0_i32, %c0_i32_0 : i32, i32, i32
  }
}

</mosaic_0001>

<bundles_post_ra>
// kernel: _forward_impl.1
= control target key start
LH: loop header
LB: loop body
LE: loop exit
PB: predicated region body
PF: predicated region fallthrough
CT: control target
= control target key end

     0   :  { %s415_s18 = smov 0   ;;  %s448_s0 = inlined_call_operand.vmem [shape: f32[2,40,256], index: 0, kind: input, shape index: {}]   ;;  %s449_s1 = inlined_call_operand.vmem [shape: f32[8,40], index: 1, kind: input, shape index: {}]   ;;  %s450_s2 = inlined_call_operand.vmem [shape: f32[8,1], index: 2, kind: input, shape index: {}]   ;;  %s451_s3 = inlined_call_operand.vmem [shape: f32[8,128], index: 3, kind: input, shape index: {}]   ;;  %s452_s4 = inlined_call_operand.vmem [shape: f32[1,128], index: 4, kind: input, shape index: {}]   ;;  %s453_s5 = inlined_call_operand.vmem [shape: f32[2,8,128], index: 5, kind: output, shape index: {}]  }
   0x1 LB: > { %s354_s19 = sadd.s32 4294967295, %s382_s18   ;;  %p358_p0 = scmp.ge.s32.totalorder %s382_s18, 1  ;;  %s382_s18 = sphi %s415_s18, %s15_s18  }
   0x2   : > { %p187_p1 = scmp.lt.s32.totalorder %s382_s18, 3 }
   0x4   : > { %p188_p2 = pnand %p358_p0, %p187_p1 }
   0x5   : > { %p214_p3 = scmp.lt.s32.totalorder (!%p188_p2), %s354_s19, 1 }
   0x6   : > { %191 = sbr.rel (%p188_p2) target bundleno = 292 (0x124), region = 40 }
   0xb   : > { %v234_v0 = vld [vmem:[%s450_s2] sm:$0xff]  ;;  %v384_v1 = vmov 0   ;;  %s455_s19 = smov (!%p214_p3, %s354_s19), 1  ;;  %vm240_vm0 = vcmask 326656  }
   0xc   : > { %375 = vset.pattern.permute.xlu0 %v384_v1  ;;  %s365_s22 = smul.u32 80, %s455_s19  ;;  %v223_v12 = vld [vmem:[%s449_s1] sm:$0xff]  ;;  %s360_s7 = sshll.u32 %s455_s19, 3 }
   0xd   : > { %237 = vperm.xlu0 %375, %v234_v0   ;;  %v289_v21 = vld [vmem:[%s451_s3] sm:$0xff]  ;;  %s222_s10 = scalar_lea.vmem %s453_s5, %s360_s7 }
   0xe   : > { %s218_s25 = scalar_lea.vmem %s448_s0, %s365_s22  ;;  %v297_v29 = vld [vmem:[%s452_s4] sm:$0x1] }
   0xf   : > { %v232_v2 = vld [vmem:[%s218_s25 + $0x40] sm:$0xff]  ;;  %v233_v3 = vld [vmem:[%s218_s25 + $0x48] sm:$0xff]  ;;  %v230_v4 = vld [vmem:[%s218_s25 + $0x30] sm:$0xff] }
  0x10   : > { %255 = vmatpush.msra.mxu0 %v232_v2  ;;  %275 = vmatpush.msra.mxu1 %v233_v3  ;;  %v231_v5 = vld [vmem:[%s218_s25 + $0x38] sm:$0xff]  ;;  %v228_v6 = vld [vmem:[%s218_s25 + $0x20] sm:$0xff]  ;;  %v229_v7 = vld [vmem:[%s218_s25 + $0x28] sm:$0xff] }
  0x11   : > { %v226_v8 = vld [vmem:[%s218_s25 + $0x10] sm:$0xff]  ;;  %v227_v9 = vld [vmem:[%s218_s25 + $0x18] sm:$0xff]  ;;  %v224_v10 = vld [vmem:[%s218_s25] sm:$0xff] }
  0x12   : > { %256 = vmatpush.msra.mxu0 %v230_v4  ;;  %276 = vmatpush.msra.mxu1 %v231_v5  ;;  %v225_v11 = vld [vmem:[%s218_s25 + $0x8] sm:$0xff] }
  0x14   : > { %257 = vmatpush.msra.mxu0 %v228_v6  ;;  %277 = vmatpush.msra.mxu1 %v229_v7 }
  0x16   : > { %258 = vmatpush.msra.mxu0 %v226_v8  ;;  %278 = vmatpush.msra.mxu1 %v227_v9 }
  0x18   : > { %259 = vmatpush.msra.mxu0 %v224_v10  ;;  %279 = vmatpush.msra.mxu1 %v225_v11 }
  0x19   : > { %361 = vmatmul.msk.f32.vlgmr.msra.gmra.mxu0 %vm240_vm0, %v223_v12  ;;  %362 = vmatmul.msk.f32.vlgmr.msra.gmra.mxu1 %vm240_vm0, %v223_v12 }
  0x7f   : > { %v238_v13 = vpop.permute.xlu0 %237 }
  0x96   : > { %v261_v14 = vpop.f32.mrf.mxu0  ;;  %v281_v15 = vpop.f32.mrf.mxu1 }
  0x97   : > { %v262_v16 = vadd.f32 %v261_v14, %v238_v13  ;;  %v282_v17 = vadd.f32 %v281_v15, %v238_v13 }
  0x99   : > { %v284_v18 = vmax.f32 %v262_v16, 0.0  ;;  %v285_v19 = vmax.f32 %v282_v17, 0.0 }
  0x9b   : > { %v286_v20 = vadd.f32 %v285_v19, %v284_v18 }
  0x9d   : > { %287 = vadd.xlane.f32.xlu0 %v286_v20 }
 0x110   : > { %v288_v22 = vpop.xlane.xlu0 %287 }
 0x111   : > { %v290_v23 = vmul.f32 %v289_v21, %v288_v22 }
 0x113   : > { %v291_v24 = vrot.slane %v290_v23, 4 }
 0x115   : > { %v292_v25 = vadd.f32 %v291_v24, %v290_v23 }
 0x117   : > { %v293_v26 = vrot.slane %v292_v25, 2 }
 0x119   : > { %v294_v27 = vadd.f32 %v293_v26, %v292_v25 }
 0x11b   : > { %v295_v28 = vrot.slane %v294_v27, 1 }
 0x11d   : > { %v296_v30 = vadd.f32 %v295_v28, %v294_v27 }
 0x11f   : > { %v298_v31 = vadd.f32 %v297_v29, %v296_v30 }
 0x121   : > { %v299_v32 = vperm.slane %v298_v31, 0 }
 0x123   : > { %300 = vst [vmem:[%s222_s10] sm:$0xff] %v299_v32 }
 0x124 PF: > { %s15_s18 = sadd.s32 1, %s382_s18  }
 0x125   : > { %p12_p4 = scmp.ge.s32.totalorder %s15_s18, 4  }
 0x127   :  { %14 = sbr.rel (!%p12_p4) target bundleno = 1 (0x1), region = 70 }

</bundles_post_ra>
